<compile_context>
chip_gen: v5e
topology: v5e:2x2
jax: 0.10.0
libtpu: 0.0.40
codegen_flags: <defaults>
</compile_context>

<pallas_src>
import math
from functools import partial

import jax
import jax.numpy as jnp
from jax.experimental import pallas as pl
from jax.experimental.pallas import tpu as pltpu


def _round_up(x: int, m: int) -> int:
    return ((x + m - 1) // m) * m


def _cdiv(a: int, b: int) -> int:
    return (a + b - 1) // b


def _choose_tile(batch: int, block_b: int) -> int:
    """Balanced, 8-aligned batch tile; >=2 tiles when batch >= 16 (v7x megacore)."""
    if batch <= 8:
        return batch                      # single full-extent block
    n_tiles = max(2, _cdiv(batch, block_b))
    tb = _round_up(_cdiv(batch, n_tiles), 8)
    return max(8, min(tb, _round_up(batch, 8)))


# ---------------------------------------------------------------------------
# Kernel
# ---------------------------------------------------------------------------
def _fwd_dyn_kernel(s_ref, a_ref, w1s_ref, w1a_ref, b1_ref, w2_ref, b2_ref, o_ref):
    # s: (TB, state_dim), a: (TB, action_dim)            [streamed, any float dtype]
    # w1s: (state_dim, Hp) bf16, w1a: (action_dim, Hp) bf16, b1: (1, Hp) f32
    # w2 : (Hp, out_dim)  bf16, b2: (1, out_dim) f32
    # o  : (TB, out_dim)  f32
    s = s_ref[...].astype(jnp.bfloat16)
    a = a_ref[...].astype(jnp.bfloat16)
    h = (jnp.dot(s, w1s_ref[...], preferred_element_type=jnp.float32)
         + jnp.dot(a, w1a_ref[...], preferred_element_type=jnp.float32)
         + b1_ref[...])
    # LeakyReLU (PyTorch default negative_slope = 0.01), computed in f32 on the VPU
    h = jnp.maximum(h, 0.01 * h)
    y = jnp.dot(h.astype(jnp.bfloat16), w2_ref[...],
                preferred_element_type=jnp.float32) + b2_ref[...]
    o_ref[...] = y.astype(o_ref.dtype)


# ---------------------------------------------------------------------------
# One-time parameter preprocessing (call OUTSIDE the hot loop)
# ---------------------------------------------------------------------------
def prepare_params(w1, b1, w2, b2, state_dim):
    """Split w1 by [state, action], zero-pad the hidden dim to 128 lanes, cast
    weights to bf16 (biases stay f32). Matches the `concat([state, action])`
    ordering of the PyTorch module.

    w1: (state_dim + action_dim, hidden)   (transpose of nn.Linear weight)
    b1: (hidden,)
    w2: (hidden, state_dim)
    b2: (state_dim,)
    """
    hidden = w1.shape[1]
    out_dim = w2.shape[1]
    hid_pad = _round_up(hidden, 128)

    w1_s = jnp.pad(w1[:state_dim].astype(jnp.float32),
                   ((0, 0), (0, hid_pad - hidden))).astype(jnp.bfloat16)
    w1_a = jnp.pad(w1[state_dim:].astype(jnp.float32),
                   ((0, 0), (0, hid_pad - hidden))).astype(jnp.bfloat16)
    b1_p = jnp.pad(b1.astype(jnp.float32), (0, hid_pad - hidden)).reshape(1, hid_pad)
    w2_p = jnp.pad(w2.astype(jnp.float32),
                   ((0, hid_pad - hidden), (0, 0))).astype(jnp.bfloat16)
    b2_p = b2.astype(jnp.float32).reshape(1, out_dim)
    return w1_s, w1_a, b1_p, w2_p, b2_p


# ---------------------------------------------------------------------------
# Forward pass
# ---------------------------------------------------------------------------
@partial(jax.jit, static_argnames=("block_b",))
def forward_dynamics(state, action, w1_s, w1_a, b1_p, w2_p, b2_p, *, block_b=1024):
    """state: (B, state_dim), action: (B, action_dim) -> (B, state_dim) f32.

    Pass bf16 state/action to halve activation HBM traffic; f32 also works
    (the kernel casts to bf16 in VMEM before feeding the MXU).
    """
    B, state_dim = state.shape
    _, action_dim = action.shape
    in_dim = state_dim + action_dim
    hid_pad = w1_s.shape[1]
    out_dim = w2_p.shape[1]

    tb = _choose_tile(B, block_b)
    n_tiles = _cdiv(B, tb)
    n_buf = 3 if n_tiles >= 3 else 2          # extra pipeline depth only when useful

    def _stream_spec(shape, index_map):
        if n_buf == 2:
            return pl.BlockSpec(shape, index_map)
        return pl.BlockSpec(shape, index_map, pipeline_mode=pl.Buffered(n_buf))

    act_itemsize = jnp.dtype(state.dtype).itemsize
    weight_bytes = 2 * (in_dim * hid_pad + hid_pad * out_dim) + 4 * (hid_pad + out_dim)
    act_buf_bytes = n_buf * tb * (in_dim * act_itemsize + out_dim * 4)
    vmem_limit = int(min(max(2 * (weight_bytes + act_buf_bytes) + (8 << 20), 32 << 20),
                         56 << 20))

    cost = pl.CostEstimate(
        flops=2 * B * (in_dim * hid_pad + hid_pad * out_dim),
        transcendentals=0,
        bytes_accessed=(B * in_dim * act_itemsize          # activations in
                        + weight_bytes                     # weights (read once)
                        + B * out_dim * 4),                # output out
    )

    out = pl.pallas_call(
        _fwd_dyn_kernel,
        out_shape=jax.ShapeDtypeStruct((B, out_dim), jnp.float32),
        grid_spec=pltpu.PrefetchScalarGridSpec(
            num_scalar_prefetch=0,
            grid=(n_tiles,),
            in_specs=[
                # activations: tiled along batch, pipelined
                _stream_spec((tb, state_dim), lambda i: (i, 0)),
                _stream_spec((tb, action_dim), lambda i: (i, 0)),
                # weights / biases: constant block index -> stay VMEM-resident
                pl.BlockSpec((state_dim, hid_pad), lambda i: (0, 0)),
                pl.BlockSpec((action_dim, hid_pad), lambda i: (0, 0)),
                pl.BlockSpec((1, hid_pad), lambda i: (0, 0)),
                pl.BlockSpec((hid_pad, out_dim), lambda i: (0, 0)),
                pl.BlockSpec((1, out_dim), lambda i: (0, 0)),
            ],
            out_specs=_stream_spec((tb, out_dim), lambda i: (i, 0)),
        ),
        compiler_params=pltpu.CompilerParams(
            dimension_semantics=("parallel",),
            vmem_limit_bytes=vmem_limit,
        ),
        cost_estimate=cost,
    )(state, action, w1_s, w1_a, b1_p, w2_p, b2_p)
    return out


# ---------------------------------------------------------------------------
# Reference / init helpers
# ---------------------------------------------------------------------------
def init_params(key, state_dim, action_dim, hidden_dim):
    """Params matching nn.Linear shapes + xavier_uniform_ weight init."""
    in_dim = state_dim + action_dim
    k1, k2, k3, k4 = jax.random.split(key, 4)

    def xavier_uniform(k, fan_in, fan_out):
        # (fan_in, fan_out) layout = transpose of PyTorch's weight.
        limit = math.sqrt(6.0 / (fan_in + fan_out))
        return jax.random.uniform(k, (fan_in, fan_out), jnp.float32, -limit, limit)

    def linear_bias(k, fan_in, fan_out):
        # PyTorch nn.Linear default bias init: U(-1/sqrt(fan_in), 1/sqrt(fan_in))
        bound = 1.0 / math.sqrt(fan_in)
        return jax.random.uniform(k, (fan_out,), jnp.float32, -bound, bound)

    w1 = xavier_uniform(k1, in_dim, hidden_dim)
    b1 = linear_bias(k2, in_dim, hidden_dim)
    w2 = xavier_uniform(k3, hidden_dim, state_dim)
    b2 = linear_bias(k4, hidden_dim, state_dim)
    return w1, b1, w2, b2


def reference_forward(state, action, w1, b1, w2, b2):
    x = jnp.concatenate([state, action], axis=-1)
    h = x @ w1 + b1
    h = jnp.where(h > 0, h, 0.01 * h)
    return h @ w2 + b2


if __name__ == "__main__":
    state_dim, action_dim, hidden_dim = 16, 4, 32

    key = jax.random.PRNGKey(0)
    kp, ks, ka, ks2, ka2 = jax.random.split(key, 5)

    w1, b1, w2, b2 = init_params(kp, state_dim, action_dim, hidden_dim)
    params = prepare_params(w1, b1, w2, b2, state_dim)   # one-time, outside hot loop

    # --- Test 1: small batch, single tile, f32 activations ---------------------
    batch = 8
    state = jax.random.normal(ks, (batch, state_dim), jnp.float32)
    action = jax.random.normal(ka, (batch, action_dim), jnp.float32)

    out = jax.block_until_ready(forward_dynamics(state, action, *params))
    ref = reference_forward(state, action, w1, b1, w2, b2)
    assert out.shape == (batch, state_dim)
    assert jnp.allclose(out, ref, atol=5e-2, rtol=5e-2), (
        f"max abs err {float(jnp.max(jnp.abs(out - ref)))}")

    # --- Test 2: ragged multi-tile batch, bf16 activations ---------------------
    # Exercises masked last-block writeback, >=2 tiles (v7x megacore path) and
    # the Buffered(3) streaming specs.
    batch2 = 520
    state2 = jax.random.normal(ks2, (batch2, state_dim), jnp.float32)
    action2 = jax.random.normal(ka2, (batch2, action_dim), jnp.float32)

    out2 = jax.block_until_ready(
        forward_dynamics(state2.astype(jnp.bfloat16), action2.astype(jnp.bfloat16),
                         *params, block_b=128))
    ref2 = reference_forward(state2, action2, w1, b1, w2, b2)
    assert out2.shape == (batch2, state_dim)
    assert jnp.allclose(out2, ref2, atol=1e-1, rtol=1e-1), (
        f"max abs err {float(jnp.max(jnp.abs(out2 - ref2)))}")

    print("KERNEL_OK")
</pallas_src>

<mosaic_0001>
module attributes {stable_mosaic.version = 11 : i64} {
  func.func @_fwd_dyn_kernel(%arg0: i32, %arg1: memref<8x16xf32, #tpu.memory_space<vmem>>, %arg2: memref<8x4xf32, #tpu.memory_space<vmem>>, %arg3: memref<16x128xbf16, #tpu.memory_space<vmem>>, %arg4: memref<4x128xbf16, #tpu.memory_space<vmem>>, %arg5: memref<1x128xf32, #tpu.memory_space<vmem>>, %arg6: memref<128x16xbf16, #tpu.memory_space<vmem>>, %arg7: memref<1x16xf32, #tpu.memory_space<vmem>>, %arg8: memref<8x16xf32, #tpu.memory_space<vmem>>) attributes {dimension_semantics = [#tpu.dimension_semantics<parallel>], iteration_bounds = array<i64: 1>, scalar_prefetch = 0 : i64, scratch_operands = 0 : i64, tpu.core_type = #tpu.core_type<tc>, window_params = [{transform_indices = @transform_0, window_bounds = array<i64: 8, 16>}, {transform_indices = @transform_1, window_bounds = array<i64: 8, 4>}, {pipeline_mode = #tpu.pipeline_mode<synchronous>, transform_indices = @transform_2, window_bounds = array<i64: 16, 128>}, {pipeline_mode = #tpu.pipeline_mode<synchronous>, transform_indices = @transform_3, window_bounds = array<i64: 4, 128>}, {pipeline_mode = #tpu.pipeline_mode<synchronous>, transform_indices = @transform_4, window_bounds = array<i64: 1, 128>}, {pipeline_mode = #tpu.pipeline_mode<synchronous>, transform_indices = @transform_5, window_bounds = array<i64: 128, 16>}, {pipeline_mode = #tpu.pipeline_mode<synchronous>, transform_indices = @transform_6, window_bounds = array<i64: 1, 16>}, {transform_indices = @transform_7, window_bounds = array<i64: 8, 16>}]} {
    %c0 = arith.constant 0 : index
    %c0_0 = arith.constant 0 : index
    %0 = vector.load %arg1[%c0, %c0_0] : memref<8x16xf32, #tpu.memory_space<vmem>>, vector<8x16xf32>
    %1 = arith.truncf %0 : vector<8x16xf32> to vector<8x16xbf16>
    %c0_1 = arith.constant 0 : index
    %c0_2 = arith.constant 0 : index
    %2 = vector.load %arg2[%c0_1, %c0_2] : memref<8x4xf32, #tpu.memory_space<vmem>>, vector<8x4xf32>
    %3 = arith.truncf %2 : vector<8x4xf32> to vector<8x4xbf16>
    %c0_3 = arith.constant 0 : index
    %c0_4 = arith.constant 0 : index
    %4 = vector.load %arg3[%c0_3, %c0_4] : memref<16x128xbf16, #tpu.memory_space<vmem>>, vector<16x128xbf16>
    %cst = arith.constant dense<0.000000e+00> : vector<8x128xf32>
    %5 = tpu.matmul %1, %4, %cst {dimension_numbers = #tpu.dot_dimension_numbers<[1], [0], [0], [1], [0, 0, 1, 1], [], []>} : vector<8x16xbf16>, vector<16x128xbf16>, vector<8x128xf32> -> vector<8x128xf32>
    %c0_5 = arith.constant 0 : index
    %c0_6 = arith.constant 0 : index
    %6 = vector.load %arg4[%c0_5, %c0_6] : memref<4x128xbf16, #tpu.memory_space<vmem>>, vector<4x128xbf16>
    %cst_7 = arith.constant dense<0.000000e+00> : vector<8x128xf32>
    %7 = tpu.matmul %3, %6, %cst_7 {dimension_numbers = #tpu.dot_dimension_numbers<[1], [0], [0], [1], [0, 0, 1, 1], [], []>} : vector<8x4xbf16>, vector<4x128xbf16>, vector<8x128xf32> -> vector<8x128xf32>
    %8 = arith.addf %5, %7 : vector<8x128xf32>
    %c0_8 = arith.constant 0 : index
    %c0_9 = arith.constant 0 : index
    %9 = vector.load %arg5[%c0_8, %c0_9] : memref<1x128xf32, #tpu.memory_space<vmem>>, vector<1x128xf32>
    %10 = vector.broadcast %9 : vector<1x128xf32> to vector<8x128xf32>
    %11 = arith.addf %8, %10 : vector<8x128xf32>
    %cst_10 = arith.constant 0.00999999977 : f32
    %12 = vector.broadcast %cst_10 : f32 to vector<8x128xf32>
    %13 = arith.mulf %12, %11 : vector<8x128xf32>
    %14 = arith.maximumf %11, %13 : vector<8x128xf32>
    %15 = arith.truncf %14 : vector<8x128xf32> to vector<8x128xbf16>
    %c0_11 = arith.constant 0 : index
    %c0_12 = arith.constant 0 : index
    %16 = vector.load %arg6[%c0_11, %c0_12] : memref<128x16xbf16, #tpu.memory_space<vmem>>, vector<128x16xbf16>
    %cst_13 = arith.constant dense<0.000000e+00> : vector<8x16xf32>
    %17 = tpu.matmul %15, %16, %cst_13 {dimension_numbers = #tpu.dot_dimension_numbers<[1], [0], [0], [1], [0, 0, 1, 1], [], []>} : vector<8x128xbf16>, vector<128x16xbf16>, vector<8x16xf32> -> vector<8x16xf32>
    %c0_14 = arith.constant 0 : index
    %c0_15 = arith.constant 0 : index
    %18 = vector.load %arg7[%c0_14, %c0_15] : memref<1x16xf32, #tpu.memory_space<vmem>>, vector<1x16xf32>
    %19 = vector.broadcast %18 : vector<1x16xf32> to vector<8x16xf32>
    %20 = arith.addf %17, %19 : vector<8x16xf32>
    %c0_16 = arith.constant 0 : index
    %c0_17 = arith.constant 0 : index
    %21 = vector.load %arg8[%c0_16, %c0_17] : memref<8x16xf32, #tpu.memory_space<vmem>>, vector<8x16xf32>
    tpu.vector_store %arg8[%c0_16, %c0_17], %20 {strides = array<i32>} : memref<8x16xf32, #tpu.memory_space<vmem>>, vector<8x16xf32>,
    return
  }
  func.func @transform_0(%arg0: i32) -> (i32, i32) {
    %c0_i32 = arith.constant 0 : i32
    %c0_i32_0 = arith.constant 0 : i32
    return %arg0, %c0_i32 : i32, i32
  }
  func.func @transform_1(%arg0: i32) -> (i32, i32) {
    %c0_i32 = arith.constant 0 : i32
    %c0_i32_0 = arith.constant 0 : i32
    return %arg0, %c0_i32 : i32, i32
  }
  func.func @transform_2(%arg0: i32) -> (i32, i32) {
    %c0_i32 = arith.constant 0 : i32
    %c0_i32_0 = arith.constant 0 : i32
    %c0_i32_1 = arith.constant 0 : i32
    return %c0_i32, %c0_i32_0 : i32, i32
  }
  func.func @transform_3(%arg0: i32) -> (i32, i32) {
    %c0_i32 = arith.constant 0 : i32
    %c0_i32_0 = arith.constant 0 : i32
    %c0_i32_1 = arith.constant 0 : i32
    return %c0_i32, %c0_i32_0 : i32, i32
  }
  func.func @transform_4(%arg0: i32) -> (i32, i32) {
    %c0_i32 = arith.constant 0 : i32
    %c0_i32_0 = arith.constant 0 : i32
    %c0_i32_1 = arith.constant 0 : i32
    return %c0_i32, %c0_i32_0 : i32, i32
  }
  func.func @transform_5(%arg0: i32) -> (i32, i32) {
    %c0_i32 = arith.constant 0 : i32
    %c0_i32_0 = arith.constant 0 : i32
    %c0_i32_1 = arith.constant 0 : i32
    return %c0_i32, %c0_i32_0 : i32, i32
  }
  func.func @transform_6(%arg0: i32) -> (i32, i32) {
    %c0_i32 = arith.constant 0 : i32
    %c0_i32_0 = arith.constant 0 : i32
    %c0_i32_1 = arith.constant 0 : i32
    return %c0_i32, %c0_i32_0 : i32, i32
  }
  func.func @transform_7(%arg0: i32) -> (i32, i32) {
    %c0_i32 = arith.constant 0 : i32
    %c0_i32_0 = arith.constant 0 : i32
    return %arg0, %c0_i32 : i32, i32
  }
}

</mosaic_0001>

<bundles_post_ra>
// kernel: forward_dynamics.1
= control target key start
LH: loop header
LB: loop body
LE: loop exit
PB: predicated region body
PF: predicated region fallthrough
CT: control target
= control target key end

     0   :  { %vm39_vm0 = vcmask 1041408   ;;  %vm35_vm1 = vcmask 31744   ;;  %vm62_vm2 = vcmask 130048   ;;  %s349_s0 = inlined_call_operand.vmem [shape: f32[8,16], index: 0, kind: input, shape index: {}]   ;;  %s350_s1 = inlined_call_operand.vmem [shape: f32[8,4], index: 1, kind: input, shape index: {}]   ;;  %s351_s2 = inlined_call_operand.vmem [shape: bf16[16,128], index: 2, kind: input, shape index: {}]   ;;  %s352_s3 = inlined_call_operand.vmem [shape: bf16[4,128], index: 3, kind: input, shape index: {}]   ;;  %s353_s4 = inlined_call_operand.vmem [shape: f32[1,128], index: 4, kind: input, shape index: {}]   ;;  %s354_s5 = inlined_call_operand.vmem [shape: bf16[128,16], index: 5, kind: input, shape index: {}]   ;;  %s355_s6 = inlined_call_operand.vmem [shape: f32[1,16], index: 6, kind: input, shape index: {}]   ;;  %s356_s7 = inlined_call_operand.hbm [shape: f32[8,16], index: 7, kind: output, shape index: {}]  }
   0x1   :  { %v34_v0 = vld [vmem:[%s352_s3] sm:$0x3]  ;;  %v231_v6 = vld [vmem:[%s354_s5 + $0x38] sm:$0xff]  ;;  %v230_v8 = vld [vmem:[%s354_s5 + $0x30] sm:$0xff] }
   0x2   :  { %v223_v1 = vld [vmem:[%s351_s2] sm:$0xff]  ;;  %v41_v3 = vsel %vm39_vm0, %v34_v0, 0  ;;  %155 = vmatpush.bf16.msra.mxu2 %v231_v6 }
   0x3   :  { %v30_v2 = vld [vmem:[%s350_s1] sm:$0xff]  ;;  %50 = vmatpush.bf16.msra.mxu0 %v41_v3  ;;  %73 = vmatpush.bf16.msra.mxu1 %v223_v1 }
   0x4   :  { %v31_v4 = vpack.c.bf16 %v30_v2, %v30_v2  ;;  %v28_v5 = vld [vmem:[%s349_s0] sm:$0xff] }
   0x5   :  { %v29_v7 = vpack.c.bf16 %v28_v5, %v28_v5 }
   0x6   :  { %12 = vsyncpa [#allocation3], 0  ;;  %185 = vmatmul.msk.bf16.vlgmr.msra.gmra.mxu0 %vm35_vm1, %v31_v4  ;;  %156 = vmatpush.bf16.msra.mxu2 %v230_v8  ;;  %v229_v9 = vld [vmem:[%s354_s5 + $0x28] sm:$0xff]  ;;  %v228_v10 = vld [vmem:[%s354_s5 + $0x20] sm:$0xff] }
   0x7   :  { %190 = vmatmul.msk.bf16.vlgmr.msra.gmra.mxu1 %vm62_vm2, %v29_v7  ;;  %v227_v11 = vld [vmem:[%s354_s5 + $0x18] sm:$0xff]  ;;  %v226_v12 = vld [vmem:[%s354_s5 + $0x10] sm:$0xff]  ;;  %v225_v13 = vld [vmem:[%s354_s5 + $0x8] sm:$0xff] }
   0x8   :  { %v224_v14 = vld [vmem:[%s354_s5] sm:$0xff]  ;;  %s261_s5 = smov [#allocation2]  }
   0x9   :  { %v233_v15 = vld [vmem:[%s353_s4] ss:$0 sm:$0xff]  ;;  %s174_s25 = sshll.u32 %s261_s5, 4  ;;  %s176_s4 = sshll.u32 %s356_s7, 4  ;;  %s175_s25 = int_to_ptr.vmem [resolvable:$true] %s174_s25  ;;  %s177_s4 = int_to_ptr.hbm [resolvable:$true] %s176_s4 }
   0xa   :  { %157 = vmatpush.bf16.msra.mxu2 %v229_v9  ;;  %v234_v25 = vld [vmem:[%s355_s6] ss:$0 sm:$0xff] }
   0xe   :  { %158 = vmatpush.bf16.msra.mxu2 %v228_v10 }
  0x12   :  { %159 = vmatpush.bf16.msra.mxu2 %v227_v11 }
  0x16   :  { %160 = vmatpush.bf16.msra.mxu2 %v226_v12 }
  0x1a   :  { %161 = vmatpush.bf16.msra.mxu2 %v225_v13 }
  0x1e   :  { %162 = vmatpush.bf16.msra.mxu2 %v224_v14 }
  0x83   :  { %v52_v16 = vpop.f32.mrf.mxu0 }
  0x84   :  { %v75_v17 = vpop.f32.mrf.mxu1 }
  0x85   :  { %v76_v18 = vadd.f32 %v75_v17, %v52_v16 }
  0x87   :  { %v83_v19 = vadd.f32 %v233_v15, %v76_v18 }
  0x89   :  { %v84_v20 = vmul.f32 0.01, %v83_v19 }
  0x8b   :  { %v85_v21 = vmax.f32 %v83_v19, %v84_v20  ;;  %v54_v22 = vpop.f32.mrf.mxu0 }
  0x8c   :  { %v77_v23 = vpop.f32.mrf.mxu1 }
  0x8d   :  { %v86_v24 = vpack.c.bf16 %v85_v21, %v85_v21 }
  0x8f   :  { %163 = vmatmul.bf16.vlgmr.msra.gmra.mxu2 %v86_v24 }
 0x112   :  { %v164_v26 = vpop.f32.mrf.mxu2 }
 0x113   :  { %v165_v27 = vadd.f32 %v234_v25, %v164_v26 }
 0x115   :  { %168 = vst.msk [vmem:[#allocation2] sm:$0xff] %vm62_vm2, %v165_v27 }
 0x116   :  { %179 = dma.vmem_to_hbm [thread:$0]  %s175_s25, 128, %s177_s4, [#allocation3]  }
 0x11a   :  { %v166_v28 = vpop.f32.mrf.mxu2 }
 0x11b   :  { %259 = dma.done.wait [#allocation3], 128  }
 0x11c   :  { %260 = vsyncadd [#allocation3], 4294967168 }
 0x11d   :  { %184 = vsyncpa [#allocation3], 1 }

</bundles_post_ra>
